<compile_context>
chip_gen: v5e
topology: v5e:2x2
jax: 0.10.0
libtpu: 0.0.40
codegen_flags: <defaults>
</compile_context>

<pallas_src>
import jax
import jax.numpy as jnp
from jax.experimental import pallas as pl
from jax.experimental.pallas import tpu as pltpu


def _layernorm(x, gamma, beta, eps=1e-5):
    # PyTorch nn.LayerNorm semantics: biased variance, eps inside sqrt.
    mean = jnp.mean(x, axis=-1, keepdims=True)
    var = jnp.mean((x - mean) ** 2, axis=-1, keepdims=True)
    return (x - mean) * jax.lax.rsqrt(var + eps) * gamma + beta


def graph_constructor_kernel(
    x_ref,        # (1, Bt*N, T)  bf16  input slab (wrapper-reshaped)
    nodevec_ref,  # (N, D)        f32   embed1 table (idx = arange(N))
    xs_ref,       # (N, D)        f32   precomputed nodevec @ W_xs (batch-invariant)
    conv_w_ref,   # (T, D)        bf16  Conv2d(1, D, (1, T)) weight, reshaped
    w_xt_ref,     # (D, D)        bf16  gated fusion: time-branch weight
    vecs_ref,     # (6, D)        f32   [conv_b, tn_gamma, tn_beta, b_xt, bn_gamma, bn_beta]
    adj_ref,      # (1, Bt, N*N)  f32   lane-dense output adjacency block
):
    _, rows, T = x_ref.shape
    N, D = nodevec_ref.shape
    Bt = rows // N

    vecs = vecs_ref[...]                      # (6, D) f32, single load
    conv_b, tn_g, tn_b = vecs[0:1], vecs[1:2], vecs[2:3]
    b_xt, bn_g, bn_b = vecs[3:4], vecs[4:5], vecs[5:6]

    # --- trans_Merge_line: Conv2d(1, dim, kernel=(1, T)) == matmul over time,
    #     folded over the Bt batch elements so the MXU M-dim is Bt*N. ---
    x = x_ref[0]                                                    # (Bt*N, T) bf16
    tn = jnp.dot(x, conv_w_ref[...], preferred_element_type=jnp.float32) + conv_b

    # --- time_norm: LayerNorm(dim), f32 ---
    tn = _layernorm(tn, tn_g, tn_b)                                 # (Bt*N, D)

    # --- gate_Fusion_1 (GMAN-style); static branch xs hoisted to wrapper ---
    xt = jnp.dot(tn.astype(jnp.bfloat16), w_xt_ref[...],
                 preferred_element_type=jnp.float32) + b_xt         # (Bt*N, D)

    # Layout-preserving major-dim split (N is a multiple of 8 at these shapes).
    tn3 = tn.reshape(Bt, N, D)
    xt3 = xt.reshape(Bt, N, D)
    nodevec = nodevec_ref[...][None]                                # (1, N, D)
    z = jax.nn.sigmoid(xs_ref[...][None] + xt3)                     # (Bt, N, D)
    h = z * nodevec + (1.0 - z) * tn3

    # residual + bn (LayerNorm(dim))
    nv = _layernorm(h + nodevec, bn_g, bn_b)                        # (Bt, N, D)

    # --- bmm(nv, nv^T) via contracting-dim einsum (no explicit transpose),
    #     relu, softmax over last axis (f32) ---
    nv_b = nv.astype(jnp.bfloat16)
    dyn = jnp.einsum("bnd,bmd->bnm", nv_b, nv_b,
                     preferred_element_type=jnp.float32)            # (Bt, N, N)
    dyn = jnp.maximum(dyn, 0.0)
    dyn = dyn - jnp.max(dyn, axis=-1, keepdims=True)                # stable softmax
    e = jnp.exp(dyn)
    adj = e * pl.reciprocal(jnp.sum(e, axis=-1, keepdims=True), approx=True)

    # --- lane-dense writeback: pack adjacency row n into lanes [n*N, (n+1)*N)
    #     of the (Bt, N*N) output slab (N static-slice stores; no vector reshape
    #     of the minor dims is required). ---
    for n in range(N):
        adj_ref[0, :, pl.ds(n * N, N)] = adj[:, n, :]


def _step_vmem_bytes(Bt, N, T, D):
    """Rough per-grid-step VMEM footprint: double-buffered blocks + weights + temps."""
    x_blk = Bt * N * T * 2                      # bf16 input block
    out_blk = Bt * N * N * 4                    # f32 lane-dense output block
    weights = (2 * N * D + 6 * D) * 4 + (T * D + D * D) * 2
    temps = 6 * Bt * N * D * 4 + 2 * Bt * N * N * 4   # live f32 temporaries
    return 2 * (x_blk + out_blk) + weights + temps


def graph_constructor2_forward(x, params, block_batch=None):
    """x: (B, 1, nodes, time_step) float32  ->  (B, nodes, nodes) float32."""
    B, in_dim, N, T = x.shape
    assert in_dim == 1
    D = params["nodevec"].shape[1]

    # ---- choose Bt (batch elements folded per grid step) --------------------
    if block_batch is None:
        bt = max(1, 512 // N)                   # target ~512 MXU rows per step
        bt = min(bt, B)
        while bt > 1 and _step_vmem_bytes(bt, N, T, D) > 24 * 1024 * 1024:
            bt -= 1                             # stay well inside v7x's 64 MiB VMEM
        if B >= 2 and pl.cdiv(B, bt) < 2:       # keep both v7x TensorCores busy
            bt = pl.cdiv(B, 2)
        block_batch = bt
    Bt = block_batch
    num_blocks = pl.cdiv(B, Bt)
    B_pad = num_blocks * Bt

    # ---- hoisted batch-invariant static branch of the gated fusion ----------
    xs = jnp.dot(params["nodevec"], params["w_xs"])                 # (N, D) f32

    # ---- wrapper-side (free) reshape + zero-pad of the input ----------------
    x2 = x.reshape(B * N, T)
    if B_pad != B:
        x2 = jnp.pad(x2, ((0, (B_pad - B) * N), (0, 0)))
    x_bf = x2.reshape(num_blocks, Bt * N, T).astype(jnp.bfloat16)

    # bf16 operands for the MXU; accumulation / LN / softmax stay f32 in-kernel.
    conv_w_bf = params["conv_w"].astype(jnp.bfloat16)
    w_xt_bf = params["w_xt"].astype(jnp.bfloat16)

    # Pack the six (1, D) vectors into one (6, D) input (one DMA / buffer pair).
    vecs = jnp.concatenate(
        [params["conv_b"], params["tn_gamma"], params["tn_beta"],
         params["b_xt"], params["bn_gamma"], params["bn_beta"]], axis=0)

    shared2 = lambda b: (0, 0)
    grid_spec = pltpu.PrefetchScalarGridSpec(
        num_scalar_prefetch=0,
        grid=(num_blocks,),
        in_specs=[
            pl.BlockSpec((1, Bt * N, T), lambda b: (b, 0, 0)),   # x slab
            pl.BlockSpec((N, D), shared2),                       # nodevec (embed1)
            pl.BlockSpec((N, D), shared2),                       # xs = nodevec @ W_xs
            pl.BlockSpec((T, D), shared2),                       # conv_w (bf16)
            pl.BlockSpec((D, D), shared2),                       # W_xt   (bf16)
            pl.BlockSpec((6, D), shared2),                       # packed biases / LN params
        ],
        out_specs=pl.BlockSpec((1, Bt, N * N), lambda b: (b, 0, 0)),
    )

    vmem_limit = int(min(64 * 1024 * 1024,
                         max(32 * 1024 * 1024, 2 * _step_vmem_bytes(Bt, N, T, D))))

    out = pl.pallas_call(
        graph_constructor_kernel,
        out_shape=jax.ShapeDtypeStruct((num_blocks, Bt, N * N), jnp.float32),
        grid_spec=grid_spec,
        compiler_params=pltpu.CompilerParams(
            dimension_semantics=("parallel",),
            vmem_limit_bytes=vmem_limit),
    )(x_bf, params["nodevec"], xs, conv_w_bf, w_xt_bf, vecs)

    return out.reshape(B_pad, N, N)[:B]


def init_params(key, nodes, dim, time_step):
    """Deterministic synthetic parameters matching the module's shapes."""
    k = jax.random.split(key, 6)
    # embed1 table evaluated at idx = arange(nodes) -> (nodes, dim), N(0,1) init
    nodevec = jax.random.normal(k[0], (nodes, dim), jnp.float32)
    # Conv2d(in_dim=1, dim, kernel=(1, time_step)) weight (dim,1,1,T) -> (T, dim)
    conv_w = jax.random.normal(k[1], (time_step, dim), jnp.float32) / jnp.sqrt(time_step)
    conv_b = jax.random.normal(k[2], (1, dim), jnp.float32) * 0.1
    # gated fusion linear layers (dim x dim)
    w_xs = jax.random.normal(k[3], (dim, dim), jnp.float32) / jnp.sqrt(dim)
    w_xt = jax.random.normal(k[4], (dim, dim), jnp.float32) / jnp.sqrt(dim)
    b_xt = jax.random.normal(k[5], (1, dim), jnp.float32) * 0.1
    # LayerNorm affine params (PyTorch default init: ones / zeros)
    ones = jnp.ones((1, dim), jnp.float32)
    zeros = jnp.zeros((1, dim), jnp.float32)
    return {
        "nodevec": nodevec,
        "conv_w": conv_w,
        "conv_b": conv_b,
        "tn_gamma": ones,
        "tn_beta": zeros,
        "w_xs": w_xs,
        "w_xt": w_xt,
        "b_xt": b_xt,
        "bn_gamma": ones,
        "bn_beta": zeros,
    }


if __name__ == "__main__":
    # Small shapes consistent with the module's forward:
    #   input = (batch_size, in_dim=1, nodes, time_step)
    batch, nodes, time_step, dim = 2, 16, 16, 32

    key = jax.random.PRNGKey(0)
    kx, kp = jax.random.split(key)
    x = jax.random.normal(kx, (batch, 1, nodes, time_step), jnp.float32)
    params = init_params(kp, nodes, dim, time_step)

    adj = graph_constructor2_forward(x, params)
    adj = jax.block_until_ready(adj)

    assert adj.shape == (batch, nodes, nodes)
    # rows of the softmaxed adjacency must sum to ~1 (approx reciprocal + bf16
    # MXU operands give ~1e-3 deviation; accumulation / softmax are f32)
    row_sums = jnp.sum(adj, axis=-1)
    assert jnp.allclose(row_sums, 1.0, atol=1e-2), row_sums

    print("KERNEL_OK")
</pallas_src>

<mosaic_0001>
module attributes {stable_mosaic.version = 11 : i64} {
  func.func @graph_constructor_kernel(%arg0: i32, %arg1: memref<1x16x16xbf16, #tpu.memory_space<vmem>>, %arg2: memref<16x32xf32, #tpu.memory_space<vmem>>, %arg3: memref<16x32xf32, #tpu.memory_space<vmem>>, %arg4: memref<16x32xbf16, #tpu.memory_space<vmem>>, %arg5: memref<32x32xbf16, #tpu.memory_space<vmem>>, %arg6: memref<6x32xf32, #tpu.memory_space<vmem>>, %arg7: memref<1x1x256xf32, #tpu.memory_space<vmem>>) attributes {dimension_semantics = [#tpu.dimension_semantics<parallel>], iteration_bounds = array<i64: 2>, scalar_prefetch = 0 : i64, scratch_operands = 0 : i64, tpu.core_type = #tpu.core_type<tc>, window_params = [{transform_indices = @transform_0, window_bounds = array<i64: 1, 16, 16>}, {pipeline_mode = #tpu.pipeline_mode<synchronous>, transform_indices = @transform_1, window_bounds = array<i64: 16, 32>}, {pipeline_mode = #tpu.pipeline_mode<synchronous>, transform_indices = @transform_2, window_bounds = array<i64: 16, 32>}, {pipeline_mode = #tpu.pipeline_mode<synchronous>, transform_indices = @transform_3, window_bounds = array<i64: 16, 32>}, {pipeline_mode = #tpu.pipeline_mode<synchronous>, transform_indices = @transform_4, window_bounds = array<i64: 32, 32>}, {pipeline_mode = #tpu.pipeline_mode<synchronous>, transform_indices = @transform_5, window_bounds = array<i64: 6, 32>}, {transform_indices = @transform_6, window_bounds = array<i64: 1, 1, 256>}]} {
    %c0 = arith.constant 0 : index
    %c0_0 = arith.constant 0 : index
    %0 = vector.load %arg6[%c0, %c0_0] : memref<6x32xf32, #tpu.memory_space<vmem>>, vector<6x32xf32>
    %1 = vector.extract_strided_slice %0 {offsets = [0, 0], sizes = [1, 32], strides = [1, 1]} : vector<6x32xf32> to vector<1x32xf32>
    %2 = vector.extract_strided_slice %0 {offsets = [1, 0], sizes = [1, 32], strides = [1, 1]} : vector<6x32xf32> to vector<1x32xf32>
    %3 = vector.extract_strided_slice %0 {offsets = [2, 0], sizes = [1, 32], strides = [1, 1]} : vector<6x32xf32> to vector<1x32xf32>
    %4 = vector.extract_strided_slice %0 {offsets = [3, 0], sizes = [1, 32], strides = [1, 1]} : vector<6x32xf32> to vector<1x32xf32>
    %5 = vector.extract_strided_slice %0 {offsets = [4, 0], sizes = [1, 32], strides = [1, 1]} : vector<6x32xf32> to vector<1x32xf32>
    %6 = vector.extract_strided_slice %0 {offsets = [5, 0], sizes = [1, 32], strides = [1, 1]} : vector<6x32xf32> to vector<1x32xf32>
    %c0_1 = arith.constant 0 : index
    %c0_2 = arith.constant 0 : index
    %c0_3 = arith.constant 0 : index
    %7 = vector.load %arg1[%c0_1, %c0_2, %c0_3] : memref<1x16x16xbf16, #tpu.memory_space<vmem>>, vector<1x16x16xbf16>
    %8 = vector.shape_cast %7 : vector<1x16x16xbf16> to vector<16x16xbf16>
    %c0_4 = arith.constant 0 : index
    %c0_5 = arith.constant 0 : index
    %9 = vector.load %arg4[%c0_4, %c0_5] : memref<16x32xbf16, #tpu.memory_space<vmem>>, vector<16x32xbf16>
    %cst = arith.constant dense<0.000000e+00> : vector<16x32xf32>
    %10 = tpu.matmul %8, %9, %cst {dimension_numbers = #tpu.dot_dimension_numbers<[1], [0], [0], [1], [0, 0, 1, 1], [], []>} : vector<16x16xbf16>, vector<16x32xbf16>, vector<16x32xf32> -> vector<16x32xf32>
    %11 = vector.broadcast %1 : vector<1x32xf32> to vector<16x32xf32>
    %12 = arith.addf %10, %11 : vector<16x32xf32>
    %cst_6 = arith.constant dense<0.000000e+00> : vector<16xf32>
    %13 = vector.multi_reduction <add>, %12, %cst_6 [1] : vector<16x32xf32> to vector<16xf32>
    %14 = vector.shape_cast %13 : vector<16xf32> to vector<16x1xf32>
    %cst_7 = arith.constant 3.200000e+01 : f32
    %15 = vector.broadcast %cst_7 : f32 to vector<16x1xf32>
    %16 = arith.divf %14, %15 : vector<16x1xf32>
    %17 = vector.broadcast %16 : vector<16x1xf32> to vector<16x32xf32>
    %18 = arith.subf %12, %17 : vector<16x32xf32>
    %19 = arith.mulf %18, %18 : vector<16x32xf32>
    %cst_8 = arith.constant dense<0.000000e+00> : vector<16xf32>
    %20 = vector.multi_reduction <add>, %19, %cst_8 [1] : vector<16x32xf32> to vector<16xf32>
    %21 = vector.shape_cast %20 : vector<16xf32> to vector<16x1xf32>
    %cst_9 = arith.constant 3.200000e+01 : f32
    %22 = vector.broadcast %cst_9 : f32 to vector<16x1xf32>
    %23 = arith.divf %21, %22 : vector<16x1xf32>
    %24 = vector.broadcast %16 : vector<16x1xf32> to vector<16x32xf32>
    %25 = arith.subf %12, %24 : vector<16x32xf32>
    %cst_10 = arith.constant 9.99999974E-6 : f32
    %26 = vector.broadcast %cst_10 : f32 to vector<16x1xf32>
    %27 = arith.addf %23, %26 : vector<16x1xf32>
    %28 = math.rsqrt %27 : vector<16x1xf32>
    %29 = vector.broadcast %28 : vector<16x1xf32> to vector<16x32xf32>
    %30 = arith.mulf %25, %29 : vector<16x32xf32>
    %31 = vector.broadcast %2 : vector<1x32xf32> to vector<16x32xf32>
    %32 = arith.mulf %30, %31 : vector<16x32xf32>
    %33 = vector.broadcast %3 : vector<1x32xf32> to vector<16x32xf32>
    %34 = arith.addf %32, %33 : vector<16x32xf32>
    %35 = arith.truncf %34 : vector<16x32xf32> to vector<16x32xbf16>
    %c0_11 = arith.constant 0 : index
    %c0_12 = arith.constant 0 : index
    %36 = vector.load %arg5[%c0_11, %c0_12] : memref<32x32xbf16, #tpu.memory_space<vmem>>, vector<32x32xbf16>
    %cst_13 = arith.constant dense<0.000000e+00> : vector<16x32xf32>
    %37 = tpu.matmul %35, %36, %cst_13 {dimension_numbers = #tpu.dot_dimension_numbers<[1], [0], [0], [1], [0, 0, 1, 1], [], []>} : vector<16x32xbf16>, vector<32x32xbf16>, vector<16x32xf32> -> vector<16x32xf32>
    %38 = vector.broadcast %4 : vector<1x32xf32> to vector<16x32xf32>
    %39 = arith.addf %37, %38 : vector<16x32xf32>
    %40 = vector.shape_cast %34 : vector<16x32xf32> to vector<1x16x32xf32>
    %41 = vector.shape_cast %39 : vector<16x32xf32> to vector<1x16x32xf32>
    %c0_14 = arith.constant 0 : index
    %c0_15 = arith.constant 0 : index
    %42 = vector.load %arg2[%c0_14, %c0_15] : memref<16x32xf32, #tpu.memory_space<vmem>>, vector<16x32xf32>
    %43 = vector.shape_cast %42 : vector<16x32xf32> to vector<1x16x32xf32>
    %c0_16 = arith.constant 0 : index
    %c0_17 = arith.constant 0 : index
    %44 = vector.load %arg3[%c0_16, %c0_17] : memref<16x32xf32, #tpu.memory_space<vmem>>, vector<16x32xf32>
    %45 = vector.shape_cast %44 : vector<16x32xf32> to vector<1x16x32xf32>
    %46 = arith.addf %45, %41 : vector<1x16x32xf32>
    %47 = arith.negf %46 : vector<1x16x32xf32>
    %48 = math.exp %47 : vector<1x16x32xf32>
    %cst_18 = arith.constant 1.000000e+00 : f32
    %49 = vector.broadcast %cst_18 : f32 to vector<1x16x32xf32>
    %50 = arith.addf %49, %48 : vector<1x16x32xf32>
    %51 = arith.divf %49, %50 : vector<1x16x32xf32>
    %52 = arith.mulf %51, %43 : vector<1x16x32xf32>
    %cst_19 = arith.constant 1.000000e+00 : f32
    %53 = vector.broadcast %cst_19 : f32 to vector<1x16x32xf32>
    %54 = arith.subf %53, %51 : vector<1x16x32xf32>
    %55 = arith.mulf %54, %40 : vector<1x16x32xf32>
    %56 = arith.addf %52, %55 : vector<1x16x32xf32>
    %57 = arith.addf %56, %43 : vector<1x16x32xf32>
    %cst_20 = arith.constant dense<0.000000e+00> : vector<1x16xf32>
    %58 = vector.multi_reduction <add>, %57, %cst_20 [2] : vector<1x16x32xf32> to vector<1x16xf32>
    %59 = vector.shape_cast %58 : vector<1x16xf32> to vector<1x16x1xf32>
    %cst_21 = arith.constant 3.200000e+01 : f32
    %60 = vector.broadcast %cst_21 : f32 to vector<1x16x1xf32>
    %61 = arith.divf %59, %60 : vector<1x16x1xf32>
    %62 = vector.broadcast %61 : vector<1x16x1xf32> to vector<1x16x32xf32>
    %63 = arith.subf %57, %62 : vector<1x16x32xf32>
    %64 = arith.mulf %63, %63 : vector<1x16x32xf32>
    %cst_22 = arith.constant dense<0.000000e+00> : vector<1x16xf32>
    %65 = vector.multi_reduction <add>, %64, %cst_22 [2] : vector<1x16x32xf32> to vector<1x16xf32>
    %66 = vector.shape_cast %65 : vector<1x16xf32> to vector<1x16x1xf32>
    %cst_23 = arith.constant 3.200000e+01 : f32
    %67 = vector.broadcast %cst_23 : f32 to vector<1x16x1xf32>
    %68 = arith.divf %66, %67 : vector<1x16x1xf32>
    %69 = vector.broadcast %61 : vector<1x16x1xf32> to vector<1x16x32xf32>
    %70 = arith.subf %57, %69 : vector<1x16x32xf32>
    %cst_24 = arith.constant 9.99999974E-6 : f32
    %71 = vector.broadcast %cst_24 : f32 to vector<1x16x1xf32>
    %72 = arith.addf %68, %71 : vector<1x16x1xf32>
    %73 = math.rsqrt %72 : vector<1x16x1xf32>
    %74 = vector.broadcast %73 : vector<1x16x1xf32> to vector<1x16x32xf32>
    %75 = arith.mulf %70, %74 : vector<1x16x32xf32>
    %76 = vector.shape_cast %5 : vector<1x32xf32> to vector<1x1x32xf32>
    %77 = vector.broadcast %76 : vector<1x1x32xf32> to vector<1x16x32xf32>
    %78 = arith.mulf %75, %77 : vector<1x16x32xf32>
    %79 = vector.shape_cast %6 : vector<1x32xf32> to vector<1x1x32xf32>
    %80 = vector.broadcast %79 : vector<1x1x32xf32> to vector<1x16x32xf32>
    %81 = arith.addf %78, %80 : vector<1x16x32xf32>
    %82 = arith.truncf %81 : vector<1x16x32xf32> to vector<1x16x32xbf16>
    "tpu.trace_start"() <{level = 10 : i32, message = "bnd,bmd->bnm"}> : () -> ()
    %cst_25 = arith.constant dense<0.000000e+00> : vector<1x16x16xf32>
    %83 = tpu.matmul %82, %82, %cst_25 {dimension_numbers = #tpu.dot_dimension_numbers<[2], [2], [1], [1], [0, 0, 0, 1, 1, 1], [0], [0]>} : vector<1x16x32xbf16>, vector<1x16x32xbf16>, vector<1x16x16xf32> -> vector<1x16x16xf32>
    "tpu.trace_stop"() : () -> ()
    %cst_26 = arith.constant 0.000000e+00 : f32
    %84 = vector.broadcast %cst_26 : f32 to vector<1x16x16xf32>
    %85 = arith.maximumf %83, %84 : vector<1x16x16xf32>
    %cst_27 = arith.constant dense<0xFF800000> : vector<1x16xf32>
    %86 = vector.multi_reduction <maximumf>, %85, %cst_27 [2] : vector<1x16x16xf32> to vector<1x16xf32>
    %87 = vector.shape_cast %86 : vector<1x16xf32> to vector<1x16x1xf32>
    %88 = vector.broadcast %87 : vector<1x16x1xf32> to vector<1x16x16xf32>
    %89 = arith.subf %85, %88 : vector<1x16x16xf32>
    %90 = math.exp %89 : vector<1x16x16xf32>
    %cst_28 = arith.constant dense<0.000000e+00> : vector<1x16xf32>
    %91 = vector.multi_reduction <add>, %90, %cst_28 [2] : vector<1x16x16xf32> to vector<1x16xf32>
    %92 = vector.shape_cast %91 : vector<1x16xf32> to vector<1x16x1xf32>
    %93 = tpu.reciprocal %92 {approx = true} : vector<1x16x1xf32> -> vector<1x16x1xf32>
    %94 = vector.broadcast %93 : vector<1x16x1xf32> to vector<1x16x16xf32>
    %95 = arith.mulf %90, %94 : vector<1x16x16xf32>
    %96 = vector.extract_strided_slice %95 {offsets = [0, 0, 0], sizes = [1, 1, 16], strides = [1, 1, 1]} : vector<1x16x16xf32> to vector<1x1x16xf32>
    %97 = vector.shape_cast %96 : vector<1x1x16xf32> to vector<1x16xf32>
    %c0_29 = arith.constant 0 : index
    %c0_30 = arith.constant 0 : index
    %c0_31 = arith.constant 0 : index
    %98 = vector.load %arg7[%c0_29, %c0_30, %c0_31] : memref<1x1x256xf32, #tpu.memory_space<vmem>>, vector<1x1x16xf32>
    %99 = vector.shape_cast %98 : vector<1x1x16xf32> to vector<1x16xf32>
    %100 = vector.shape_cast %97 : vector<1x16xf32> to vector<1x1x16xf32>
    tpu.vector_store %arg7[%c0_29, %c0_30, %c0_31], %100 {strides = array<i32>} : memref<1x1x256xf32, #tpu.memory_space<vmem>>, vector<1x1x16xf32>,
    %101 = vector.extract_strided_slice %95 {offsets = [0, 1, 0], sizes = [1, 1, 16], strides = [1, 1, 1]} : vector<1x16x16xf32> to vector<1x1x16xf32>
    %102 = vector.shape_cast %101 : vector<1x1x16xf32> to vector<1x16xf32>
    %c0_32 = arith.constant 0 : index
    %c0_33 = arith.constant 0 : index
    %c16 = arith.constant 16 : index
    %103 = vector.load %arg7[%c0_32, %c0_33, %c16] : memref<1x1x256xf32, #tpu.memory_space<vmem>>, vector<1x1x16xf32>
    %104 = vector.shape_cast %103 : vector<1x1x16xf32> to vector<1x16xf32>
    %105 = vector.shape_cast %102 : vector<1x16xf32> to vector<1x1x16xf32>
    tpu.vector_store %arg7[%c0_32, %c0_33, %c16], %105 {strides = array<i32>} : memref<1x1x256xf32, #tpu.memory_space<vmem>>, vector<1x1x16xf32>,
    %106 = vector.extract_strided_slice %95 {offsets = [0, 2, 0], sizes = [1, 1, 16], strides = [1, 1, 1]} : vector<1x16x16xf32> to vector<1x1x16xf32>
    %107 = vector.shape_cast %106 : vector<1x1x16xf32> to vector<1x16xf32>
    %c0_34 = arith.constant 0 : index
    %c0_35 = arith.constant 0 : index
    %c32 = arith.constant 32 : index
    %108 = vector.load %arg7[%c0_34, %c0_35, %c32] : memref<1x1x256xf32, #tpu.memory_space<vmem>>, vector<1x1x16xf32>
    %109 = vector.shape_cast %108 : vector<1x1x16xf32> to vector<1x16xf32>
    %110 = vector.shape_cast %107 : vector<1x16xf32> to vector<1x1x16xf32>
    tpu.vector_store %arg7[%c0_34, %c0_35, %c32], %110 {strides = array<i32>} : memref<1x1x256xf32, #tpu.memory_space<vmem>>, vector<1x1x16xf32>,
    %111 = vector.extract_strided_slice %95 {offsets = [0, 3, 0], sizes = [1, 1, 16], strides = [1, 1, 1]} : vector<1x16x16xf32> to vector<1x1x16xf32>
    %112 = vector.shape_cast %111 : vector<1x1x16xf32> to vector<1x16xf32>
    %c0_36 = arith.constant 0 : index
    %c0_37 = arith.constant 0 : index
    %c48 = arith.constant 48 : index
    %113 = vector.load %arg7[%c0_36, %c0_37, %c48] : memref<1x1x256xf32, #tpu.memory_space<vmem>>, vector<1x1x16xf32>
    %114 = vector.shape_cast %113 : vector<1x1x16xf32> to vector<1x16xf32>
    %115 = vector.shape_cast %112 : vector<1x16xf32> to vector<1x1x16xf32>
    tpu.vector_store %arg7[%c0_36, %c0_37, %c48], %115 {strides = array<i32>} : memref<1x1x256xf32, #tpu.memory_space<vmem>>, vector<1x1x16xf32>,
    %116 = vector.extract_strided_slice %95 {offsets = [0, 4, 0], sizes = [1, 1, 16], strides = [1, 1, 1]} : vector<1x16x16xf32> to vector<1x1x16xf32>
    %117 = vector.shape_cast %116 : vector<1x1x16xf32> to vector<1x16xf32>
    %c0_38 = arith.constant 0 : index
    %c0_39 = arith.constant 0 : index
    %c64 = arith.constant 64 : index
    %118 = vector.load %arg7[%c0_38, %c0_39, %c64] : memref<1x1x256xf32, #tpu.memory_space<vmem>>, vector<1x1x16xf32>
    %119 = vector.shape_cast %118 : vector<1x1x16xf32> to vector<1x16xf32>
    %120 = vector.shape_cast %117 : vector<1x16xf32> to vector<1x1x16xf32>
    tpu.vector_store %arg7[%c0_38, %c0_39, %c64], %120 {strides = array<i32>} : memref<1x1x256xf32, #tpu.memory_space<vmem>>, vector<1x1x16xf32>,
    %121 = vector.extract_strided_slice %95 {offsets = [0, 5, 0], sizes = [1, 1, 16], strides = [1, 1, 1]} : vector<1x16x16xf32> to vector<1x1x16xf32>
    %122 = vector.shape_cast %121 : vector<1x1x16xf32> to vector<1x16xf32>
    %c0_40 = arith.constant 0 : index
    %c0_41 = arith.constant 0 : index
    %c80 = arith.constant 80 : index
    %123 = vector.load %arg7[%c0_40, %c0_41, %c80] : memref<1x1x256xf32, #tpu.memory_space<vmem>>, vector<1x1x16xf32>
    %124 = vector.shape_cast %123 : vector<1x1x16xf32> to vector<1x16xf32>
    %125 = vector.shape_cast %122 : vector<1x16xf32> to vector<1x1x16xf32>
    tpu.vector_store %arg7[%c0_40, %c0_41, %c80], %125 {strides = array<i32>} : memref<1x1x256xf32, #tpu.memory_space<vmem>>, vector<1x1x16xf32>,
    %126 = vector.extract_strided_slice %95 {offsets = [0, 6, 0], sizes = [1, 1, 16], strides = [1, 1, 1]} : vector<1x16x16xf32> to vector<1x1x16xf32>
    %127 = vector.shape_cast %126 : vector<1x1x16xf32> to vector<1x16xf32>
    %c0_42 = arith.constant 0 : index
    %c0_43 = arith.constant 0 : index
    %c96 = arith.constant 96 : index
    %128 = vector.load %arg7[%c0_42, %c0_43, %c96] : memref<1x1x256xf32, #tpu.memory_space<vmem>>, vector<1x1x16xf32>
    %129 = vector.shape_cast %128 : vector<1x1x16xf32> to vector<1x16xf32>
    %130 = vector.shape_cast %127 : vector<1x16xf32> to vector<1x1x16xf32>
    tpu.vector_store %arg7[%c0_42, %c0_43, %c96], %130 {strides = array<i32>} : memref<1x1x256xf32, #tpu.memory_space<vmem>>, vector<1x1x16xf32>,
    %131 = vector.extract_strided_slice %95 {offsets = [0, 7, 0], sizes = [1, 1, 16], strides = [1, 1, 1]} : vector<1x16x16xf32> to vector<1x1x16xf32>
    %132 = vector.shape_cast %131 : vector<1x1x16xf32> to vector<1x16xf32>
    %c0_44 = arith.constant 0 : index
    %c0_45 = arith.constant 0 : index
    %c112 = arith.constant 112 : index
    %133 = vector.load %arg7[%c0_44, %c0_45, %c112] : memref<1x1x256xf32, #tpu.memory_space<vmem>>, vector<1x1x16xf32>
    %134 = vector.shape_cast %133 : vector<1x1x16xf32> to vector<1x16xf32>
    %135 = vector.shape_cast %132 : vector<1x16xf32> to vector<1x1x16xf32>
    tpu.vector_store %arg7[%c0_44, %c0_45, %c112], %135 {strides = array<i32>} : memref<1x1x256xf32, #tpu.memory_space<vmem>>, vector<1x1x16xf32>,
    %136 = vector.extract_strided_slice %95 {offsets = [0, 8, 0], sizes = [1, 1, 16], strides = [1, 1, 1]} : vector<1x16x16xf32> to vector<1x1x16xf32>
    %137 = vector.shape_cast %136 : vector<1x1x16xf32> to vector<1x16xf32>
    %c0_46 = arith.constant 0 : index
    %c0_47 = arith.constant 0 : index
    %c128 = arith.constant 128 : index
    %138 = vector.load %arg7[%c0_46, %c0_47, %c128] : memref<1x1x256xf32, #tpu.memory_space<vmem>>, vector<1x1x16xf32>
    %139 = vector.shape_cast %138 : vector<1x1x16xf32> to vector<1x16xf32>
    %140 = vector.shape_cast %137 : vector<1x16xf32> to vector<1x1x16xf32>
    tpu.vector_store %arg7[%c0_46, %c0_47, %c128], %140 {strides = array<i32>} : memref<1x1x256xf32, #tpu.memory_space<vmem>>, vector<1x1x16xf32>,
    %141 = vector.extract_strided_slice %95 {offsets = [0, 9, 0], sizes = [1, 1, 16], strides = [1, 1, 1]} : vector<1x16x16xf32> to vector<1x1x16xf32>
    %142 = vector.shape_cast %141 : vector<1x1x16xf32> to vector<1x16xf32>
    %c0_48 = arith.constant 0 : index
    %c0_49 = arith.constant 0 : index
    %c144 = arith.constant 144 : index
    %143 = vector.load %arg7[%c0_48, %c0_49, %c144] : memref<1x1x256xf32, #tpu.memory_space<vmem>>, vector<1x1x16xf32>
    %144 = vector.shape_cast %143 : vector<1x1x16xf32> to vector<1x16xf32>
    %145 = vector.shape_cast %142 : vector<1x16xf32> to vector<1x1x16xf32>
    tpu.vector_store %arg7[%c0_48, %c0_49, %c144], %145 {strides = array<i32>} : memref<1x1x256xf32, #tpu.memory_space<vmem>>, vector<1x1x16xf32>,
    %146 = vector.extract_strided_slice %95 {offsets = [0, 10, 0], sizes = [1, 1, 16], strides = [1, 1, 1]} : vector<1x16x16xf32> to vector<1x1x16xf32>
    %147 = vector.shape_cast %146 : vector<1x1x16xf32> to vector<1x16xf32>
    %c0_50 = arith.constant 0 : index
    %c0_51 = arith.constant 0 : index
    %c160 = arith.constant 160 : index
    %148 = vector.load %arg7[%c0_50, %c0_51, %c160] : memref<1x1x256xf32, #tpu.memory_space<vmem>>, vector<1x1x16xf32>
    %149 = vector.shape_cast %148 : vector<1x1x16xf32> to vector<1x16xf32>
    %150 = vector.shape_cast %147 : vector<1x16xf32> to vector<1x1x16xf32>
    tpu.vector_store %arg7[%c0_50, %c0_51, %c160], %150 {strides = array<i32>} : memref<1x1x256xf32, #tpu.memory_space<vmem>>, vector<1x1x16xf32>,
    %151 = vector.extract_strided_slice %95 {offsets = [0, 11, 0], sizes = [1, 1, 16], strides = [1, 1, 1]} : vector<1x16x16xf32> to vector<1x1x16xf32>
    %152 = vector.shape_cast %151 : vector<1x1x16xf32> to vector<1x16xf32>
    %c0_52 = arith.constant 0 : index
    %c0_53 = arith.constant 0 : index
    %c176 = arith.constant 176 : index
    %153 = vector.load %arg7[%c0_52, %c0_53, %c176] : memref<1x1x256xf32, #tpu.memory_space<vmem>>, vector<1x1x16xf32>
    %154 = vector.shape_cast %153 : vector<1x1x16xf32> to vector<1x16xf32>
    %155 = vector.shape_cast %152 : vector<1x16xf32> to vector<1x1x16xf32>
    tpu.vector_store %arg7[%c0_52, %c0_53, %c176], %155 {strides = array<i32>} : memref<1x1x256xf32, #tpu.memory_space<vmem>>, vector<1x1x16xf32>,
    %156 = vector.extract_strided_slice %95 {offsets = [0, 12, 0], sizes = [1, 1, 16], strides = [1, 1, 1]} : vector<1x16x16xf32> to vector<1x1x16xf32>
    %157 = vector.shape_cast %156 : vector<1x1x16xf32> to vector<1x16xf32>
    %c0_54 = arith.constant 0 : index
    %c0_55 = arith.constant 0 : index
    %c192 = arith.constant 192 : index
    %158 = vector.load %arg7[%c0_54, %c0_55, %c192] : memref<1x1x256xf32, #tpu.memory_space<vmem>>, vector<1x1x16xf32>
    %159 = vector.shape_cast %158 : vector<1x1x16xf32> to vector<1x16xf32>
    %160 = vector.shape_cast %157 : vector<1x16xf32> to vector<1x1x16xf32>
    tpu.vector_store %arg7[%c0_54, %c0_55, %c192], %160 {strides = array<i32>} : memref<1x1x256xf32, #tpu.memory_space<vmem>>, vector<1x1x16xf32>,
    %161 = vector.extract_strided_slice %95 {offsets = [0, 13, 0], sizes = [1, 1, 16], strides = [1, 1, 1]} : vector<1x16x16xf32> to vector<1x1x16xf32>
    %162 = vector.shape_cast %161 : vector<1x1x16xf32> to vector<1x16xf32>
    %c0_56 = arith.constant 0 : index
    %c0_57 = arith.constant 0 : index
    %c208 = arith.constant 208 : index
    %163 = vector.load %arg7[%c0_56, %c0_57, %c208] : memref<1x1x256xf32, #tpu.memory_space<vmem>>, vector<1x1x16xf32>
    %164 = vector.shape_cast %163 : vector<1x1x16xf32> to vector<1x16xf32>
    %165 = vector.shape_cast %162 : vector<1x16xf32> to vector<1x1x16xf32>
    tpu.vector_store %arg7[%c0_56, %c0_57, %c208], %165 {strides = array<i32>} : memref<1x1x256xf32, #tpu.memory_space<vmem>>, vector<1x1x16xf32>,
    %166 = vector.extract_strided_slice %95 {offsets = [0, 14, 0], sizes = [1, 1, 16], strides = [1, 1, 1]} : vector<1x16x16xf32> to vector<1x1x16xf32>
    %167 = vector.shape_cast %166 : vector<1x1x16xf32> to vector<1x16xf32>
    %c0_58 = arith.constant 0 : index
    %c0_59 = arith.constant 0 : index
    %c224 = arith.constant 224 : index
    %168 = vector.load %arg7[%c0_58, %c0_59, %c224] : memref<1x1x256xf32, #tpu.memory_space<vmem>>, vector<1x1x16xf32>
    %169 = vector.shape_cast %168 : vector<1x1x16xf32> to vector<1x16xf32>
    %170 = vector.shape_cast %167 : vector<1x16xf32> to vector<1x1x16xf32>
    tpu.vector_store %arg7[%c0_58, %c0_59, %c224], %170 {strides = array<i32>} : memref<1x1x256xf32, #tpu.memory_space<vmem>>, vector<1x1x16xf32>,
    %171 = vector.extract_strided_slice %95 {offsets = [0, 15, 0], sizes = [1, 1, 16], strides = [1, 1, 1]} : vector<1x16x16xf32> to vector<1x1x16xf32>
    %172 = vector.shape_cast %171 : vector<1x1x16xf32> to vector<1x16xf32>
    %c0_60 = arith.constant 0 : index
    %c0_61 = arith.constant 0 : index
    %c240 = arith.constant 240 : index
    %173 = vector.load %arg7[%c0_60, %c0_61, %c240] : memref<1x1x256xf32, #tpu.memory_space<vmem>>, vector<1x1x16xf32>
    %174 = vector.shape_cast %173 : vector<1x1x16xf32> to vector<1x16xf32>
    %175 = vector.shape_cast %172 : vector<1x16xf32> to vector<1x1x16xf32>
    tpu.vector_store %arg7[%c0_60, %c0_61, %c240], %175 {strides = array<i32>} : memref<1x1x256xf32, #tpu.memory_space<vmem>>, vector<1x1x16xf32>,
    return
  }
  func.func @transform_0(%arg0: i32) -> (i32, i32, i32) {
    %c0_i32 = arith.constant 0 : i32
    %c0_i32_0 = arith.constant 0 : i32
    %c0_i32_1 = arith.constant 0 : i32
    return %arg0, %c0_i32, %c0_i32_0 : i32, i32, i32
  }
  func.func @transform_1(%arg0: i32) -> (i32, i32) {
    %c0_i32 = arith.constant 0 : i32
    %c0_i32_0 = arith.constant 0 : i32
    %c0_i32_1 = arith.constant 0 : i32
    return %c0_i32, %c0_i32_0 : i32, i32
  }
  func.func @transform_2(%arg0: i32) -> (i32, i32) {
    %c0_i32 = arith.constant 0 : i32
    %c0_i32_0 = arith.constant 0 : i32
    %c0_i32_1 = arith.constant 0 : i32
    return %c0_i32, %c0_i32_0 : i32, i32
  }
  func.func @transform_3(%arg0: i32) -> (i32, i32) {
    %c0_i32 = arith.constant 0 : i32
    %c0_i32_0 = arith.constant 0 : i32
    %c0_i32_1 = arith.constant 0 : i32
    return %c0_i32, %c0_i32_0 : i32, i32
  }
  func.func @transform_4(%arg0: i32) -> (i32, i32) {
    %c0_i32 = arith.constant 0 : i32
    %c0_i32_0 = arith.constant 0 : i32
    %c0_i32_1 = arith.constant 0 : i32
    return %c0_i32, %c0_i32_0 : i32, i32
  }
  func.func @transform_5(%arg0: i32) -> (i32, i32) {
    %c0_i32 = arith.constant 0 : i32
    %c0_i32_0 = arith.constant 0 : i32
    %c0_i32_1 = arith.constant 0 : i32
    return %c0_i32, %c0_i32_0 : i32, i32
  }
  func.func @transform_6(%arg0: i32) -> (i32, i32, i32) {
    %c0_i32 = arith.constant 0 : i32
    %c0_i32_0 = arith.constant 0 : i32
    %c0_i32_1 = arith.constant 0 : i32
    return %arg0, %c0_i32, %c0_i32_0 : i32, i32, i32
  }
}

</mosaic_0001>

<bundles_post_ra>
// kernel: tpu_custom_call.1
= control target key start
LH: loop header
LB: loop body
LE: loop exit
PB: predicated region body
PF: predicated region fallthrough
CT: control target
= control target key end

     0   :  { %11 = vsyncpa [#allocation3], 0  ;;  %s1771_s0 = inlined_call_operand.hbm [shape: bf16[2,16,16], index: 0, kind: input, shape index: {}]   ;;  %s1772_s1 = inlined_call_operand.hbm [shape: f32[16,32], index: 1, kind: input, shape index: {}]   ;;  %s1773_s2 = inlined_call_operand.hbm [shape: f32[16,32], index: 2, kind: input, shape index: {}]   ;;  %s1774_s3 = inlined_call_operand.hbm [shape: bf16[16,32], index: 3, kind: input, shape index: {}]   ;;  %s1775_s4 = inlined_call_operand.hbm [shape: bf16[32,32], index: 4, kind: input, shape index: {}]   ;;  %s1776_s5 = inlined_call_operand.hbm [shape: f32[6,32], index: 5, kind: input, shape index: {}]   ;;  %s1777_s6 = inlined_call_operand.hbm [shape: f32[2,1,256], index: 6, kind: output, shape index: {}]  }
   0x1   :  { %13 = vsyncpa [#allocation3 + $0x1], 0 }
   0x2   :  { %14 = vsyncpa [#allocation6], 0 }
   0x3   :  { %15 = vsyncpa [#allocation9], 0 }
   0x4   :  { %16 = vsyncpa [#allocation12], 0 }
   0x5   :  { %17 = vsyncpa [#allocation4], 0 }
   0x6   :  { %19 = vsyncpa [#allocation4 + $0x1], 0  ;;  %s1391_s21 = smov 0   ;;  %s1393_s22 = smov 0  }
   0x7   :  { %s1395_s23 = smov 0   ;;  %s1397_s24 = smov 0  }
   0x8 LB: > { %s198_s27 = sshll.u32 %s1772_s1, 4  ;;  %s1415_s28 = sadd.s32 4294967295, %s1337_s24   ;;  %s1337_s24 = sphi %s1397_s24, %s1822_s24   ;;  %s1333_s23 = sphi %s1395_s23, %s1821_s23   ;;  %s1329_s22 = sphi %s1393_s22, %s1820_s22   ;;  %s1325_s21 = sphi %s1391_s21, %s1819_s21   ;;  %s199_s27 = int_to_ptr.hbm [resolvable:$true] %s198_s27 }
   0x9   : > { %p896_p0 = scmp.ge.s32.totalorder %s1337_s24, 1  ;;  %p46_p1 = scmp.eq.s32.totalorder %s1415_s28, 0 }
   0xa   : > { %p187_p2 = scmp.lt.s32.totalorder %s1337_s24, 3  ;;  %s1339_s30 = smov [#allocation5]  }
   0xb   : > { %s200_s7 = sshll.u32 %s1339_s30, 4  ;;  %s226_s10 = sshll.u32 %s1774_s3, 4  ;;  %s201_s7 = int_to_ptr.vmem [resolvable:$true] %s200_s7  ;;  %s227_s10 = int_to_ptr.hbm [resolvable:$true] %s226_s10 }
   0xc   : > { %p1420_p3 = pnand %p896_p0, %p187_p2  ;;  %s1340_s12 = smov [#allocation8]  }
   0xd   : > { %s228_s13 = sshll.u32 %s1340_s12, 4  ;;  %s1341_s14 = smov 128   ;;  %s229_s13 = int_to_ptr.vmem [resolvable:$true] %s228_s13 }
   0xe   : > { %p968_p4 = pneg %p1420_p3  ;;  %s1342_s15 = smov 8  }
   0xf   : > { %s1778_s16 = smov 64   ;;  %s1779_s17 = smov 4  }
  0x10   : > { %p1432_p6 = pnand %p968_p4, %p46_p1  ;;  %s212_s20 = sshll.u32 %s1773_s2, 4  ;;  %s213_s20 = int_to_ptr.hbm [resolvable:$true] %s212_s20 }
  0x11   : > { %s1345_s25 = smov [#allocation7]   ;;  %s1346_s8 = smov [#allocation10]  }
  0x12   : > { %971 = dma.hbm_to_vmem [thread:$0]  (!%p1432_p6), %s199_s27, 256, %s201_s7, [#allocation6], %s1341_s14, %s1341_s14, %s1342_s15  }
  0x13   : > { %977 = dma.hbm_to_vmem [thread:$0]  (!%p1432_p6), %s227_s10, 128, %s229_s13, [#allocation9], %s1778_s16, %s1778_s16, %s1779_s17  }
  0x14   : > { %s214_s26 = sshll.u32 %s1345_s25, 4  ;;  %s240_s7 = sshll.u32 %s1775_s4, 4  ;;  %s215_s26 = int_to_ptr.vmem [resolvable:$true] %s214_s26  ;;  %s241_s7 = int_to_ptr.hbm [resolvable:$true] %s240_s7 }
  0x15   : > { %974 = dma.hbm_to_vmem [thread:$0]  (!%p1432_p6), %s213_s20, 256, %s215_s26, [#allocation6], %s1341_s14, %s1341_s14, %s1342_s15  }
  0x16   : > { %s242_s9 = sshll.u32 %s1346_s8, 4  ;;  %s255_s13 = sshll.u32 %s1776_s5, 4  ;;  %s243_s9 = int_to_ptr.vmem [resolvable:$true] %s242_s9  ;;  %s256_s13 = int_to_ptr.hbm [resolvable:$true] %s255_s13 }
  0x17   : > { %980 = dma.hbm_to_vmem [thread:$0]  (!%p1432_p6), %s241_s7, 256, %s243_s9, [#allocation9], %s1778_s16, %s1778_s16, %s1779_s17  }
  0x18   : > { %s1347_s14 = smov [#allocation11]   ;;  %s895_s18 = sadd.s32 4294967294, %s1337_s24  }
  0x19   : > { %s257_s15 = sshll.u32 %s1347_s14, 4  ;;  %s1463_s19 = sadd.s32 1, %s1337_s24   ;;  %s258_s15 = int_to_ptr.vmem [resolvable:$true] %s257_s15 }
  0x1a   : > { %983 = dma.hbm_to_vmem [thread:$0]  (!%p1432_p6), %s256_s13, 128, %s258_s15, [#allocation12]  }
  0x1b   : > { %s32_s20 = sadd.s32 1, %s1333_s23  ;;  %s29_s25 = ssub.s32 %s1337_s24, %s1463_s19 }
  0x1c   : > { %p39_p7 = scmp.ne.s32.totalorder %s1333_s23, %s1329_s22  ;;  %p30_p8 = scmp.eq.s32.totalorder %s29_s25, 0 }
  0x1d   : > { %p40_p9 = scmp.eq.s32.totalorder %s1337_s24, 0  ;;  %p45_p10 = scmp.ne.s32.totalorder %s1329_s22, %s1325_s21 }
  0x1e   : > { %p174_p11 = scmp.eq.s32.totalorder %s1415_s28, 1  ;;  %p180_p0 = scmp.eq.s32.totalorder %s895_s18, 1 }
  0x1f   : > { %s1475_s26 = scalar_select %p30_p8, %s1333_s23, %s32_s20  }
  0x20   : > { %p1479_p12 = por %p46_p1, %p45_p10  ;;  %p1483_p13 = por %p174_p11, %p39_p7 }
  0x21   : > { %p41_p2 = por %p40_p9, %p39_p7  ;;  %s268_s30 = sand.u32 1, %s1333_s23  }
  0x22   : > { %p1488_p4 = por %p180_p0, %p45_p10  ;;  %p997_p6 = scmp.lt.s32.totalorder %s1337_s24, 2 }
  0x23   : > { %s903_s8 = sshll.u32 %s268_s30, 3  ;;  %s939_s9 = sshll.u32 %s1337_s24, 3 }
  0x24   : > { %s277_s13 = scalar_lea.hbm %s1771_s0, %s939_s9  ;;  %s272_s15 = scalar_lea.vmem [#allocation2], %s903_s8 }
  0x25   : > { %s278_s14 = sshll.u32 %s277_s13, 4  ;;  %s280_s20 = sshll.u32 %s272_s15, 4  ;;  %s279_s14 = int_to_ptr.hbm [resolvable:$true] %s278_s14  ;;  %s281_s20 = int_to_ptr.vmem [resolvable:$true] %s280_s20 }
  0x26   : > { %p1497_p8 = pnand %p997_p6, %p41_p2  ;;  %s269_s25 = scalar_lea.sflag [#allocation3], %s268_s30 }
  0x27   : > { %s1229_s16 = sshra.s32 %s279_s14, 4  ;;  %s1236_s8 = scalar_lea.hbm %s1771_s0, 16  ;;  %s1230_s16 = int_to_ptr.hbm [resolvable:$true] %s1229_s16 }
  0x28   : > { %s1231_s17 = scalar_lea.hbm %s1230_s16, 8  ;;  %p1233_p9 = pneg %p1497_p8 }
  0x29   : > { %p1232_p7 = scmp.ne.s32.totalorder %s1230_s16, %s1231_s17  ;;  %p1237_p0 = scmp.lt.s32.totalorder %s1230_s16, %s1771_s0 }
  0x2a   : > { %p1238_p2 = scmp.lt.s32.totalorder %s1236_s8, %s1231_s17 }
  0x2b   : > { %p1234_p10 = pnand %p1233_p9, %p1232_p7 }
  0x2c   : > { %p1239_p6 = por %p1238_p2, %p1237_p0 }
  0x2d   : > { %p1235_p11 = pneg %p1234_p10 }
  0x2f   : > { %p1240_p5 = pnand %p1239_p6, %p1235_p11 }
  0x31   : > { %1243 = shalt.err (!%p1240_p5)
}
  0x32   : > { %s1789_s30 = smov 4   ;;  %s1790_s15 = smov 64  }
  0x33   : > { %987 = dma.hbm_to_vmem [thread:$0]  (!%p1497_p8), %s279_s14, 128, %s281_s20, %s269_s25, %s1790_s15, %s1790_s15, %s1789_s30  }
  0x34   : > { %292 = sbr.rel (%p1420_p3) target bundleno = 1542 (0x606), region = 44  ;;  %s1517_s9 = sand.u32 (!%p1420_p3), 1, %s1329_s22  }
  0x35   : > { %s907_s16 = sshll.u32 (!%p1420_p3), %s1517_s9, 3  ;;  %s295_s17 = scalar_lea.sflag (!%p1420_p3), [#allocation3], %s1517_s9 }
  0x36   : > { %s298_s10 = scalar_lea.vmem (!%p1420_p3), [#allocation2], %s907_s16 }
  0x39   : > { %1304 = dma.done.wait (%p1479_p12), %s295_s17, 128  }
  0x3a   : > { %1306 = vsyncadd (%p1479_p12), %s295_s17, 4294967168 }
  0x3b   : > { %1308 = dma.done.wait (%p46_p1), [#allocation6], 512  }
  0x3c   : > { %1310 = vsyncadd (%p46_p1), [#allocation6], 4294966784 }
  0x3d   : > { %1312 = dma.done.wait (%p46_p1), [#allocation9], 384  }
  0x3e   : > { %1314 = vsyncadd (%p46_p1), [#allocation9], 4294966912 }
  0x3f   : > { %1316 = dma.done.wait (%p46_p1), [#allocation12], 128  }
  0x40   : > { %1318 = vsyncadd (%p46_p1), [#allocation12], 4294967168  ;;  %v941_v0 = vld [vmem:[#allocation8] sm:$0xff]  ;;  %v940_v1 = vld [vmem:[%s298_s10] sm:$0xff]  ;;  %vm371_vm0 = vcmask 130048   ;;  %vm389_vm1 = vcmask 261120  }
  0x41   : > { %382 = vmatpush.bf16.msra.mxu0 %v941_v0  ;;  %v1538_v2 = vld [vmem:[#allocation11] sm:$0x3f]  ;;  %v1348_v10 = vmov 32.0   ;;  %v943_v27 = vld [vmem:[#allocation10 + $0x8] sm:$0xff]  ;;  %v942_v29 = vld [vmem:[#allocation10] sm:$0xff]  ;;  %s913_s29 = sshll.u32 %s1517_s9, 1 }
  0x42   : > { %v359_v3 = vperm.slane %v1538_v2, 0  ;;  %1053 = vrcp.f32 %v1348_v10  ;;  %474 = vmatpush.bf16.msra.mxu1 %v943_v27  ;;  %v441_v48 = vperm.slane %v1538_v2, 1  ;;  %v444_v53 = vperm.slane %v1538_v2, 2  ;;  %v484_v60 = vld [vmem:[#allocation7] sm:$0xff]  ;;  %s1573_s11 = scalar_lea.vmem [#allocation13], %s913_s29  ;;  %s1349_s14 = smov 16  }
  0x43   : > { %v452_v58 = vperm.slane %v1538_v2, 3  ;;  %s1350_s20 = smov 32   ;;  %s1351_s18 = smov 48  }
  0x44   : > { %922 = vmatmul.msk.bf16.vlgmr.msra.gmra.mxu0 %vm371_vm0, %v940_v1  ;;  %v485_v1 = vld [vmem:[#allocation7 + $0x8] sm:$0xff]  ;;  %s1352_s25 = smov 64   ;;  %s1353_s8 = smov 80  }
  0x45   : > { %s1354_s12 = smov 96   ;;  %s1355_s13 = smov 112  }
  0x46   : > { %475 = vmatpush.bf16.msra.mxu1 %v942_v29  ;;  %s936_s30 = sshll.u32 %s1415_s28, 1  ;;  %s774_s10 = sshll.u32 %s1573_s11, 4  ;;  %s775_s10 = int_to_ptr.vmem [resolvable:$true] %s774_s10 }
  0x47   : > { %s772_s17 = scalar_lea.hbm %s1777_s6, %s936_s30  ;;  %s762_s28 = scalar_lea.sflag [#allocation4], %s1517_s9 }
  0x48   : > { %v1054_v11 = vpop.eup %1053  ;;  %s776_s29 = sshll.u32 %s772_s17, 4  ;;  %s777_s29 = int_to_ptr.hbm [resolvable:$true] %s776_s29 }
  0x49   : > { %v397_v12 = vmul.f32 32.0, %v1054_v11  ;;  %vm401_vm2 = vweird.f32 %v1054_v11 }
  0x4b   : > { %v398_v13 = vsub.f32 1.0, %v397_v12 }
  0x4d   : > { %v399_v14 = vmul.f32 %v1054_v11, %v398_v13 }
  0x4f   : > { %v400_v15 = vadd.f32 %v1054_v11, %v399_v14 }
  0x51   : > { %v1543_v16 = vsel %vm401_vm2, %v1054_v11, %v400_v15 }
  0xc1   : > { %v384_v4 = vpop.f32.mrf.mxu0 }
  0xc2   : > { %v385_v5 = vadd.f32 %v384_v4, %v359_v3 }
  0xc4   : > { %v390_v6 = vsel %vm389_vm1, %v385_v5, 0.0 }
  0xc5   : > { %391 = vadd.xlane.f32.xlu0 %v390_v6 }
  0xc9   : > { %v386_v7 = vpop.f32.mrf.mxu0 }
  0xca   : > { %v387_v8 = vadd.f32 %v386_v7, %v359_v3 }
  0xcc   : > { %v393_v9 = vsel %vm389_vm1, %v387_v8, 0.0 }
  0xcd   : > { %394 = vadd.xlane.f32.xlu0 %v393_v9 }
 0x138   : > { %v392_v17 = vpop.xlane.xlu0 %391 }
 0x139   : > { %v403_v18 = vmul.f32 %v1543_v16, %v392_v17 }
 0x13b   : > { %v405_v19 = vsub.f32 %v385_v5, %v403_v18 }
 0x13d   : > { %v407_v20 = vmul.f32 %v405_v19, %v405_v19 }
 0x13f   : > { %v409_v21 = vsel %vm389_vm1, %v407_v20, 0.0 }
 0x140   : > { %410 = vadd.xlane.f32.xlu1 %v409_v21  ;;  %v395_v22 = vpop.xlane.xlu0 %394 }
 0x141   : > { %v404_v23 = vmul.f32 %v1543_v16, %v395_v22  ;;  %v482_v22 = vld [vmem:[#allocation5] sm:$0xff] }
 0x143   : > { %v406_v24 = vsub.f32 %v387_v8, %v404_v23 }
 0x145   : > { %v408_v25 = vmul.f32 %v406_v24, %v406_v24 }
 0x147   : > { %v412_v26 = vsel %vm389_vm1, %v408_v25, 0.0 }
 0x148   : > { %413 = vadd.xlane.f32.xlu1 %v412_v26 }
 0x1b3   : > { %v411_v28 = vpop.xlane.xlu1 %410 }
 0x1b4   : > { %v415_v30 = vmul.f32 %v411_v28, %v1543_v16 }
 0x1b6   : > { %v417_v31 = vadd.f32 1e-05, %v415_v30 }
 0x1b8   : > { %1055 = vrsqrt.f32 %v417_v31  ;;  %vm425_vm4 = vweird.f32 %v417_v31 }
 0x1bb   : > { %v414_v32 = vpop.xlane.xlu1 %413 }
 0x1bc   : > { %v416_v33 = vmul.f32 %v414_v32, %v1543_v16 }
 0x1be   : > { %v1056_v34 = vpop.eup %1055  ;;  %v418_v35 = vadd.f32 1e-05, %v416_v33 }
 0x1bf   : > { %v420_v36 = vmul.f32 %v1056_v34, %v417_v31  ;;  %vm426_vm3 = vweird.f32 %v1056_v34 }
 0x1c0   : > { %1057 = vrsqrt.f32 %v418_v35  ;;  %vm427_vm5 = vmor %vm425_vm4, %vm426_vm3  ;;  %vm435_vm7 = vweird.f32 %v418_v35 }
 0x1c1   : > { %v421_v37 = vmul.f32 %v1056_v34, %v420_v36  ;;  %v483_v36 = vld [vmem:[#allocation5 + $0x8] sm:$0xff] }
 0x1c3   : > { %v422_v38 = vmul.f32 0.5, %v421_v37 }
 0x1c5   : > { %v423_v39 = vsub.f32 1.5, %v422_v38 }
 0x1c6   : > { %v1058_v40 = vpop.eup %1057 }
 0x1c7   : > { %v424_v41 = vmul.f32 %v1056_v34, %v423_v39  ;;  %v430_v42 = vmul.f32 %v1058_v40, %v418_v35  ;;  %vm436_vm6 = vweird.f32 %v1058_v40 }
 0x1c8   : > { %vm437_vm8 = vmor %vm435_vm7, %vm436_vm6 }
 0x1c9   : > { %v431_v43 = vmul.f32 %v1058_v40, %v430_v42  ;;  %v428_v44 = vsel %vm427_vm5, %v1056_v34, %v424_v41 }
 0x1ca   : > { %v439_v47 = vmul.f32 %v428_v44, %v405_v19 }
 0x1cb   : > { %v432_v45 = vmul.f32 0.5, %v431_v43 }
 0x1cc   : > { %v442_v52 = vmul.f32 %v441_v48, %v439_v47 }
 0x1cd   : > { %v433_v46 = vsub.f32 1.5, %v432_v45 }
 0x1ce   : > { %v445_v55 = vadd.f32 %v444_v53, %v442_v52 }
 0x1cf   : > { %v434_v49 = vmul.f32 %v1058_v40, %v433_v46 }
 0x1d1   : > { %v438_v50 = vsel %vm437_vm8, %v1058_v40, %v434_v49 }
 0x1d2   : > { %v440_v51 = vmul.f32 %v438_v50, %v406_v24 }
 0x1d4   : > { %v443_v54 = vmul.f32 %v441_v48, %v440_v51 }
 0x1d6   : > { %v446_v56 = vadd.f32 %v444_v53, %v443_v54 }
 0x1d8   : > { %v447_v57 = vpack.c.bf16 %v446_v56, %v445_v55 }
 0x1da   : > { %931 = vmatmul.msk.bf16.vlgmr.msra.gmra.mxu1 %vm389_vm1, %v447_v57 }
 0x257   : > { %v477_v59 = vpop.f32.mrf.mxu1 }
 0x258   : > { %v478_v61 = vadd.f32 %v477_v59, %v452_v58 }
 0x25a   : > { %v486_v62 = vadd.f32 %v484_v60, %v478_v61 }
 0x25c   : > { %v932_v63 = vmul.f32 -1.442695, %v486_v62 }
 0x25e   : > { %1059 = vpow2.f32 %v932_v63 }
 0x25f   : > { %v479_v0 = vpop.f32.mrf.mxu1 }
 0x260   : > { %v480_v3 = vadd.f32 %v479_v0, %v452_v58 }
 0x262   : > { %v487_v4 = vadd.f32 %v485_v1, %v480_v3 }
 0x264   : > { %v1060_v5 = vpop.eup %1059  ;;  %v933_v6 = vmul.f32 -1.442695, %v487_v4 }
 0x265   : > { %v494_v7 = vadd.f32 1.0, %v1060_v5 }
 0x266   : > { %1061 = vpow2.f32 %v933_v6 }
 0x267   : > { %1063 = vrcp.f32 %v494_v7  ;;  %v507_v13 = vand.u32 2147483648, %v494_v7  ;;  %v505_v15 = vand.u32 2147483647, %v494_v7  ;;  %vm501_vm10 = vweird.f32 %v494_v7 }
 0x269   : > { %v508_v19 = vor.u32 1.1754944e-38, %v507_v13  ;;  %vm506_vm12 = vcmp.eq.f32.partialorder %v505_v15, 8.507059e+37 }
 0x26c   : > { %v1062_v8 = vpop.eup %1061 }
 0x26d   : > { %v1064_v9 = vpop.eup %1063  ;;  %v495_v10 = vadd.f32 1.0, %v1062_v8 }
 0x26e   : > { %v497_v11 = vmul.f32 %v1064_v9, %v494_v7  ;;  %vm502_vm9 = vweird.f32 %v1064_v9 }
 0x26f   : > { %1065 = vrcp.f32 %v495_v10  ;;  %vm503_vm11 = vmor %vm501_vm10, %vm502_vm9  ;;  %v520_v26 = vand.u32 2147483647, %v495_v10  ;;  %v522_v27 = vand.u32 2147483648, %v495_v10  ;;  %vm516_vm14 = vweird.f32 %v495_v10 }
 0x270   : > { %v498_v12 = vsub.f32 1.0, %v497_v11 }
 0x271   : > { %v523_v33 = vor.u32 1.1754944e-38, %v522_v27  ;;  %vm521_vm2 = vcmp.eq.f32.partialorder %v520_v26, 8.507059e+37 }
 0x272   : > { %v499_v14 = vmul.f32 %v1064_v9, %v498_v12  ;;  %v583_v12 = vperm.slane %v1538_v2, 5 }
 0x274   : > { %v500_v17 = vadd.f32 %v1064_v9, %v499_v14 }
 0x275   : > { %v1066_v18 = vpop.eup %1065 }
 0x276   : > { %v504_v20 = vsel %vm503_vm11, %v1064_v9, %v500_v17  ;;  %v512_v21 = vmul.f32 %v1066_v18, %v495_v10  ;;  %vm517_vm13 = vweird.f32 %v1066_v18  ;;  %v580_v9 = vperm.slane %v1538_v2, 4 }
 0x277   : > { %v509_v23 = vsel %vm506_vm12, %v508_v19, %v504_v20  ;;  %vm518_vm15 = vmor %vm516_vm14, %vm517_vm13 }
 0x278   : > { %v528_v24 = vsub.f32 1.0, %v509_v23  ;;  %v513_v25 = vsub.f32 1.0, %v512_v21  ;;  %v526_v28 = vmul.f32 %v509_v23, %v482_v22 }
 0x27a   : > { %v530_v29 = vmul.f32 %v528_v24, %v445_v55  ;;  %v514_v30 = vmul.f32 %v1066_v18, %v513_v25 }
 0x27c   : > { %v532_v31 = vadd.f32 %v530_v29, %v526_v28  ;;  %v515_v32 = vadd.f32 %v1066_v18, %v514_v30 }
 0x27e   : > { %v534_v34 = vadd.f32 %v532_v31, %v482_v22  ;;  %v519_v35 = vsel %vm518_vm15, %v1066_v18, %v515_v32 }
 0x27f   : > { %v524_v37 = vsel %vm521_vm2, %v523_v33, %v519_v35 }
 0x280   : > { %v536_v38 = vsel %vm389_vm1, %v534_v34, 0.0  ;;  %v529_v39 = vsub.f32 1.0, %v524_v37  ;;  %v527_v40 = vmul.f32 %v524_v37, %v483_v36 }
 0x281   : > { %537 = vadd.xlane.f32.xlu2 %v536_v38 }
 0x282   : > { %v531_v41 = vmul.f32 %v529_v39, %v446_v56 }
 0x284   : > { %v533_v42 = vadd.f32 %v531_v41, %v527_v40 }
 0x286   : > { %v535_v43 = vadd.f32 %v533_v42, %v483_v36  ;;  %v634_v42 = vlaneseq }
 0x288   : > { %v539_v44 = vsel %vm389_vm1, %v535_v43, 0.0  ;;  %vm1583_vm9 = vcmp.lt.s32.totalorder %v634_v42, 32  ;;  %vm1588_vm10 = vcmp.ge.s32.totalorder %v634_v42, 32  ;;  %vm1593_vm11 = vcmp.lt.s32.totalorder %v634_v42, 48 }
 0x289   : > { %540 = vadd.xlane.f32.xlu2 %v539_v44  ;;  %vm1598_vm12 = vcmp.ge.s32.totalorder %v634_v42, 48  ;;  %vm1603_vm13 = vcmp.lt.s32.totalorder %v634_v42, 64  ;;  %vm658_vm15 = vmand %vm1588_vm10, %vm1593_vm11  ;;  %vm707_vm10 = vcmp.lt.s32.totalorder %v634_v42, 128 }
 0x28a   : > { %vm1781_vm2 = vmand %vm1598_vm12, %vm1603_vm13 }
 0x2f4   : > { %v538_v45 = vpop.xlane.xlu2 %537 }
 0x2f5   : > { %v542_v46 = vmul.f32 %v538_v45, %v1543_v16 }
 0x2f7   : > { %v544_v47 = vsub.f32 %v534_v34, %v542_v46 }
 0x2f9   : > { %v546_v48 = vmul.f32 %v544_v47, %v544_v47 }
 0x2fb   : > { %v548_v49 = vsel %vm389_vm1, %v546_v48, 0.0 }
 0x2fc   : > { %549 = vadd.xlane.f32.xlu0 %v548_v49  ;;  %v541_v50 = vpop.xlane.xlu2 %540 }
 0x2fd   : > { %v543_v51 = vmul.f32 %v541_v50, %v1543_v16 }
 0x2ff   : > { %v545_v52 = vsub.f32 %v535_v43, %v543_v51 }
 0x301   : > { %v547_v53 = vmul.f32 %v545_v52, %v545_v52 }
 0x303   : > { %v551_v54 = vsel %vm389_vm1, %v547_v53, 0.0 }
 0x304   : > { %552 = vadd.xlane.f32.xlu1 %v551_v54 }
 0x36f   : > { %v550_v55 = vpop.xlane.xlu0 %549 }
 0x370   : > { %v554_v56 = vmul.f32 %v550_v55, %v1543_v16 }
 0x372   : > { %v556_v57 = vadd.f32 1e-05, %v554_v56 }
 0x374   : > { %1067 = vrsqrt.f32 %v556_v57  ;;  %vm564_vm4 = vweird.f32 %v556_v57 }
 0x377   : > { %v553_v58 = vpop.xlane.xlu1 %552 }
 0x378   : > { %v555_v59 = vmul.f32 %v553_v58, %v1543_v16 }
 0x37a   : > { %v1068_v60 = vpop.eup %1067  ;;  %v557_v61 = vadd.f32 1e-05, %v555_v59 }
 0x37b   : > { %v559_v62 = vmul.f32 %v1068_v60, %v556_v57  ;;  %vm565_vm3 = vweird.f32 %v1068_v60 }
 0x37c   : > { %1069 = vrsqrt.f32 %v557_v61  ;;  %vm566_vm5 = vmor %vm564_vm4, %vm565_vm3  ;;  %vm574_vm7 = vweird.f32 %v557_v61  ;;  %vm1638_vm3 = vcmp.ge.s32.totalorder %v634_v42, 64  ;;  %vm1643_vm4 = vcmp.lt.s32.totalorder %v634_v42, 80 }
 0x37d   : > { %v560_v63 = vmul.f32 %v1068_v60, %v559_v62 }
 0x37f   : > { %v561_v0 = vmul.f32 0.5, %v560_v63 }
 0x381   : > { %v562_v1 = vsub.f32 1.5, %v561_v0 }
 0x382   : > { %v1070_v3 = vpop.eup %1069 }
 0x383   : > { %v563_v4 = vmul.f32 %v1068_v60, %v562_v1  ;;  %v569_v5 = vmul.f32 %v1070_v3, %v557_v61  ;;  %vm575_vm6 = vweird.f32 %v1070_v3 }
 0x384   : > { %vm576_vm8 = vmor %vm574_vm7, %vm575_vm6  ;;  %vm1658_vm6 = vcmp.ge.s32.totalorder %v634_v42, 80  ;;  %vm1663_vm7 = vcmp.lt.s32.totalorder %v634_v42, 96 }
 0x385   : > { %v567_v6 = vsel %vm566_vm5, %v1068_v60, %v563_v4  ;;  %v570_v7 = vmul.f32 %v1070_v3, %v569_v5  ;;  %vm1780_vm5 = vmand %vm1638_vm3, %vm1643_vm4 }
 0x386   : > { %v578_v8 = vmul.f32 %v567_v6, %v544_v47 }
 0x387   : > { %v571_v10 = vmul.f32 0.5, %v570_v7 }
 0x388   : > { %v581_v11 = vmul.f32 %v580_v9, %v578_v8 }
 0x389   : > { %v572_v16 = vsub.f32 1.5, %v571_v10 }
 0x38a   : > { %v584_v17 = vadd.f32 %v583_v12, %v581_v11 }
 0x38b   : > { %v573_v13 = vmul.f32 %v1070_v3, %v572_v16 }
 0x38c   : > { %v586_v20 = vpack.c.bf16 %v584_v17, %v584_v17 }
 0x38d   : > { %v577_v14 = vsel %vm576_vm8, %v1070_v3, %v573_v13  ;;  %vm1668_vm8 = vcmp.ge.s32.totalorder %v634_v42, 96 }
 0x38e   : > { %v579_v15 = vmul.f32 %v577_v14, %v545_v52  ;;  %v590_v22 = vunpack.c.l.b16 %v586_v20 }
 0x390   : > { %v582_v18 = vmul.f32 %v580_v9, %v579_v15 }
 0x392   : > { %v585_v19 = vadd.f32 %v583_v12, %v582_v18 }
 0x394   : > { %v587_v21 = vpack.c.bf16 %v585_v19, %v585_v19 }
 0x396   : > { %v591_v23 = vunpack.c.l.b16 %v587_v21 }
 0x398   : > { %v592_v24 = vpack.c.b16 %v591_v23, %v590_v22 }
 0x39a   : > { %v594_v25 = vsel %vm389_vm1, %v592_v24, 0 }
 0x39b   : > { %603 = vmatpush.bf16.xpose.msra.mxu2 %v594_v25 }
 0x3a2   : > { %934 = vmatmul.msk.bf16.vlgmr.msra.gmra.mxu2 %vm389_vm1, %v592_v24  ;;  %vm636_vm1 = vcmp.lt.s32.totalorder %v634_v42, 16 }
 0x425   : > { %v605_v26 = vpop.f32.mrf.mxu2 }
 0x426   : > { %v610_v2 = vmax.f32 %v605_v26, 0.0 }
 0x428   : > { %v612_v27 = vsel %vm371_vm0, %v610_v2, -inf }
 0x429   : > { %613 = vmax.xlane.f32.xlu2 %v612_v27 }
 0x42d   : > { %v607_v28 = vpop.f32.mrf.mxu2 }
 0x42e   : > { %v611_v29 = vmax.f32 %v607_v28, 0.0 }
 0x430   : > { %v615_v30 = vsel %vm371_vm0, %v611_v29, -inf }
 0x431   : > { %616 = vmax.xlane.f32.xlu1 %v615_v30 }
 0x49c   : > { %v614_v31 = vpop.xlane.xlu2 %613 }
 0x49d   : > { %v618_v32 = vsub.f32 %v610_v2, %v614_v31 }
 0x49f   : > { %v620_v33 = vmul.f32 1.442695, %v618_v32 }
 0x4a1   : > { %1071 = vpow2.f32 %v620_v33 }
 0x4a4   : > { %v617_v34 = vpop.xlane.xlu1 %616 }
 0x4a5   : > { %v619_v35 = vsub.f32 %v611_v29, %v617_v34 }
 0x4a7   : > { %v1072_v36 = vpop.eup %1071  ;;  %v622_v37 = vmul.f32 1.442695, %v619_v35 }
 0x4a8   : > { %v624_v38 = vsel %vm371_vm0, %v1072_v36, 0.0 }
 0x4a9   : > { %1073 = vpow2.f32 %v622_v37  ;;  %625 = vadd.xlane.f32.xlu0 %v624_v38 }
 0x4af   : > { %v1074_v39 = vpop.eup %1073 }
 0x4b0   : > { %v627_v40 = vsel %vm371_vm0, %v1074_v39, 0.0  ;;  %vm1578_vm0 = vcmp.ge.s32.totalorder %v634_v42, 16 }
 0x4b1   : > { %628 = vadd.xlane.f32.xlu2 %v627_v40  ;;  %vm648_vm14 = vmand %vm1578_vm0, %vm1583_vm9  ;;  %vm706_vm9 = vcmp.ge.s32.totalorder %v634_v42, 112 }
 0x4b2   : > { %vm1816_vm0 = vmand %vm1638_vm3, %vm1643_vm4 }
 0x4b3   : > { %vm708_vm11 = vmand %vm706_vm9, %vm707_vm10 }
 0x51c   : > { %v626_v41 = vpop.xlane.xlu0 %625 }
 0x51d   : > { %1075 = vrcp.f32 %v626_v41 }
 0x523   : > { %v1076_v43 = vpop.eup %1075 }
 0x524   : > { %v632_v44 = vmul.f32 %v1076_v43, %v1072_v36  ;;  %v629_v45 = vpop.xlane.xlu2 %628 }
 0x525   : > { %1077 = vrcp.f32 %v629_v45 }
 0x526   : > { %640 = vst [vmem:[#allocation1] sm:$0xff] %v632_v44 }
 0x527   : > { %638 = vst.msk [vmem:[%s1573_s11] sm:$0x1] %vm636_vm1, %v632_v44 }
 0x52b   : > { %v1078_v46 = vpop.eup %1077 }
 0x52c   : > { %v633_v47 = vmul.f32 %v1078_v46, %v1074_v39 }
 0x52d   : > { %v642_v48 = vld [vmem:[#allocation1 + $0x1] ss:$9 sm:$0xff] }
 0x52e   : > { %650 = vst [vmem:[#allocation1] sm:$0xff] %v632_v44  ;;  %643 = vrot.lane.b32.xlu0 %v642_v48, %s1349_s14 }
 0x52f   : > { %710 = vst.msk [vmem:[%s1573_s11 + $0x1] sm:$0x1] %vm636_vm1, %v633_v47  ;;  %vm1673_vm1 = vcmp.lt.s32.totalorder %v634_v42, 112 }
 0x535   : > { %v652_v49 = vld [vmem:[#allocation1 + $0x2] ss:$9 sm:$0xff] }
 0x536   : > { %660 = vst [vmem:[#allocation1] sm:$0xff] %v632_v44  ;;  %653 = vrot.lane.b32.xlu2 %v652_v49, %s1350_s20 }
 0x53d   : > { %v662_v50 = vld [vmem:[#allocation1 + $0x3] ss:$9 sm:$0xff] }
 0x53e   : > { %663 = vrot.lane.b32.xlu2 %v662_v50, %s1351_s18  ;;  %670 = vst [vmem:[#allocation1] sm:$0xff] %v632_v44 }
 0x545   : > { %v672_v51 = vld [vmem:[#allocation1 + $0x4] ss:$9 sm:$0xff] }
 0x546   : > { %673 = vrot.lane.b32.xlu0 %v672_v51, %s1352_s25  ;;  %680 = vst [vmem:[#allocation1] sm:$0xff] %v632_v44 }
 0x54d   : > { %v682_v52 = vld [vmem:[#allocation1 + $0x5] ss:$9 sm:$0xff] }
 0x54e   : > { %690 = vst [vmem:[#allocation1] sm:$0xff] %v632_v44  ;;  %683 = vrot.lane.b32.xlu1 %v682_v52, %s1353_s8 }
 0x555   : > { %v692_v53 = vld [vmem:[#allocation1 + $0x6] ss:$9 sm:$0xff] }
 0x556   : > { %700 = vst [vmem:[#allocation1] sm:$0xff] %v632_v44  ;;  %693 = vrot.lane.b32.xlu2 %v692_v53, %s1354_s12 }
 0x55d   : > { %v702_v54 = vld [vmem:[#allocation1 + $0x7] ss:$9 sm:$0xff] }
 0x55e   : > { %712 = vst [vmem:[#allocation1] sm:$0xff] %v633_v47 }
 0x565   : > { %v714_v55 = vld [vmem:[#allocation1 + $0x1] ss:$9 sm:$0xff] }
 0x566   : > { %715 = vrot.lane.b32.xlu1 %v714_v55, %s1349_s14  ;;  %719 = vst [vmem:[#allocation1] sm:$0xff] %v633_v47  ;;  %s1273_s14 = sshra.s32 %s777_s29, 4  ;;  %s1274_s14 = int_to_ptr.hbm [resolvable:$true] %s1273_s14 }
 0x567   : > { %p1280_p12 = scmp.lt.s32.totalorder %s1274_s14, %s1777_s6 }
 0x56d   : > { %v721_v56 = vld [vmem:[#allocation1 + $0x2] ss:$9 sm:$0xff] }
 0x56e   : > { %722 = vrot.lane.b32.xlu0 %v721_v56, %s1350_s20  ;;  %726 = vst [vmem:[#allocation1] sm:$0xff] %v633_v47  ;;  %s1275_s20 = scalar_lea.hbm %s1274_s14, 2 }
 0x56f   : > { %p1276_p1 = scmp.ne.s32.totalorder %s1274_s14, %s1275_s20 }
 0x571   : > { %p1277_p3 = pnand %p1276_p1, %p1483_p13 }
 0x573   : > { %p1278_p5 = pneg %p1277_p3 }
 0x575   : > { %v728_v57 = vld [vmem:[#allocation1 + $0x3] ss:$9 sm:$0xff] }
 0x576   : > { %729 = vrot.lane.b32.xlu1 %v728_v57, %s1351_s18  ;;  %733 = vst [vmem:[#allocation1] sm:$0xff] %v633_v47 }
 0x57d   : > { %v735_v58 = vld [vmem:[#allocation1 + $0x4] ss:$9 sm:$0xff] }
 0x57e   : > { %736 = vrot.lane.b32.xlu2 %v735_v58, %s1352_s25  ;;  %740 = vst [vmem:[#allocation1] sm:$0xff] %v633_v47 }
 0x585   : > { %v742_v59 = vld [vmem:[#allocation1 + $0x5] ss:$9 sm:$0xff] }
 0x586   : > { %743 = vrot.lane.b32.xlu0 %v742_v59, %s1353_s8  ;;  %747 = vst [vmem:[#allocation1] sm:$0xff] %v633_v47  ;;  %s1279_s8 = scalar_lea.hbm %s1777_s6, 4 }
 0x587   : > { %p1281_p8 = scmp.lt.s32.totalorder %s1279_s8, %s1275_s20 }
 0x589   : > { %p1282_p7 = por %p1281_p8, %p1280_p12 }
 0x58b   : > { %p1283_p9 = pnand %p1282_p7, %p1278_p5 }
 0x58d   : > { %v749_v60 = vld [vmem:[#allocation1 + $0x6] ss:$9 sm:$0xff] }
 0x58e   : > { %703 = vrot.lane.b32.xlu0 %v702_v54, %s1355_s13  ;;  %750 = vrot.lane.b32.xlu1 %v749_v60, %s1354_s12  ;;  %754 = vst [vmem:[#allocation1] sm:$0xff] %v633_v47 }
 0x590   : > { %v654_v62 = vpop.permute.xlu2 %653 }
 0x595   : > { %v756_v61 = vld [vmem:[#allocation1 + $0x7] ss:$9 sm:$0xff] }
 0x596   : > { %757 = vrot.lane.b32.xlu2 %v756_v61, %s1355_s13 }
 0x598   : > { %v664_v7 = vpop.permute.xlu2 %663 }
 0x5a0   : > { %v644_v6 = vpop.permute.xlu0 %643 }
 0x5a1   : > { %649 = vst.msk [vmem:[%s1573_s11] sm:$0x1] %vm648_vm14, %v644_v6 }
 0x5a2   : > { %659 = vst.msk [vmem:[%s1573_s11] sm:$0x1] %vm658_vm15, %v654_v62 }
 0x5a3   : > { %669 = vst.msk [vmem:[%s1573_s11] sm:$0x1] %vm1781_vm2, %v664_v7  ;;  %vm1782_vm2 = vmand %vm1668_vm8, %vm1673_vm1 }
 0x5b0   : > { %v694_v15 = vpop.permute.xlu2 %693 }
 0x5b8   : > { %v674_v10 = vpop.permute.xlu0 %673 }
 0x5b9   : > { %679 = vst.msk [vmem:[%s1573_s11] sm:$0x1] %vm1780_vm5, %v674_v10  ;;  %vm688_vm5 = vmand %vm1658_vm6, %vm1663_vm7 }
 0x5c0   : > { %v684_v14 = vpop.permute.xlu1 %683 }
 0x5c1   : > { %689 = vst.msk [vmem:[%s1573_s11] sm:$0x1] %vm688_vm5, %v684_v14 }
 0x5c2   : > { %699 = vst.msk [vmem:[%s1573_s11] sm:$0x1] %vm1782_vm2, %v694_v15  ;;  %vm1815_vm2 = vmand %vm1598_vm12, %vm1603_vm13 }
 0x5c3   : > { %vm1817_vm12 = vmand %vm1668_vm8, %vm1673_vm1 }
 0x5d8   : > { %v716_v17 = vpop.permute.xlu1 %715  ;;  %v737_v20 = vpop.permute.xlu2 %736 }
 0x5d9   : > { %718 = vst.msk [vmem:[%s1573_s11 + $0x1] sm:$0x1] %vm648_vm14, %v716_v17 }
 0x5e0   : > { %v723_v18 = vpop.permute.xlu0 %722 }
 0x5e1   : > { %725 = vst.msk [vmem:[%s1573_s11 + $0x1] sm:$0x1] %vm658_vm15, %v723_v18 }
 0x5e8   : > { %v730_v19 = vpop.permute.xlu1 %729 }
 0x5e9   : > { %732 = vst.msk [vmem:[%s1573_s11 + $0x1] sm:$0x1] %vm1815_vm2, %v730_v19 }
 0x5ea   : > { %739 = vst.msk [vmem:[%s1573_s11 + $0x1] sm:$0x1] %vm1816_vm0, %v737_v20 }
 0x5f0   : > { %v758_v24 = vpop.permute.xlu2 %757 }
 0x5f8   : > { %v744_v21 = vpop.permute.xlu0 %743 }
 0x5f9   : > { %746 = vst.msk [vmem:[%s1573_s11 + $0x1] sm:$0x1] %vm688_vm5, %v744_v21 }
 0x600   : > { %v704_v22 = vpop.permute.xlu0 %703  ;;  %v751_v23 = vpop.permute.xlu1 %750 }
 0x601   : > { %709 = vst.msk [vmem:[%s1573_s11] sm:$0x1] %vm708_vm11, %v704_v22 }
 0x602   : > { %753 = vst.msk [vmem:[%s1573_s11 + $0x1] sm:$0x1] %vm1817_vm12, %v751_v23 }
 0x603   : > { %760 = vst.msk [vmem:[%s1573_s11 + $0x1] sm:$0x1] %vm708_vm11, %v758_v24 }
 0x604   : > { %1286 = shalt.err (!%p1283_p9)
}
 0x605   : > { %966 = dma.vmem_to_hbm [thread:$0]  (%p1483_p13), %s775_s10, 32, %s777_s29, %s762_s28  }
 0x606 PF: > { %s788_s9 = sand.u32 1, %s1325_s21   ;;  %p1818_p10 = scmp.ge.s32.totalorder %s1337_s24, 2 }
 0x607   : > { %s789_s11 = scalar_lea.sflag [#allocation4], %s788_s9 }
 0x608   : > { %p989_p11 = pnand %p1818_p10, %p1488_p4 }
 0x60a   : > { %p990_p0 = pneg %p989_p11 }
 0x60c   : > { %1320 = dma.done.wait (%p990_p0), %s789_s11, 32  }
 0x60d   : > { %1322 = vsyncadd (%p990_p0), %s789_s11, 4294967264  ;;  %p22_p2 = scmp.ge.s32.totalorder %s1463_s19, 4   ;;  %s1819_s21 = smov %s1329_s22 }
 0x60e   : > { %s1820_s22 = smov %s1333_s23  ;;  %s1821_s23 = smov %s1475_s26 }
 0x60f   : > { %s1822_s24 = smov %s1463_s19  ;;  %24 = sbr.rel (!%p22_p2) target bundleno = 8 (0x8), region = 123 }
 0x614   :  { %795 = vsyncpa [#allocation3], 1 }
 0x615   :  { %797 = vsyncpa [#allocation3 + $0x1], 1 }
 0x616   :  { %798 = vsyncpa [#allocation6], 1 }
 0x617   :  { %799 = vsyncpa [#allocation9], 1 }
 0x618   :  { %800 = vsyncpa [#allocation12], 1 }
 0x619   :  { %801 = vsyncpa [#allocation4], 1 }
 0x61a   :  { %803 = vsyncpa [#allocation4 + $0x1], 1 }

</bundles_post_ra>
